<compile_context>
chip_gen: v7x
topology: tpu7x:2x2x1
jax: 0.10.0
libtpu: 0.0.40
codegen_flags: <defaults>
</compile_context>

<pallas_src>
import functools

import jax
import jax.numpy as jnp
from jax.experimental import pallas as pl
from jax.experimental.pallas import tpu as pltpu

_LANES = 128
_SUBLANES = 8


def _round_up(v, m):
    return ((v + m - 1) // m) * m


def _num_tensorcores_per_device():
    """2 TensorCores per JAX device on v4 / v5p / v7x-class parts, else 1."""
    try:
        kind = jax.devices()[0].device_kind.lower()
    except Exception:
        return 1
    return 2 if any(t in kind for t in ("v7", "v4", "v5p")) else 1


def _vmem_capacity_bytes():
    try:
        return int(pltpu.get_tpu_info().vmem_capacity_bytes)
    except Exception:
        return 64 * 1024 * 1024           # conservative: v7x per-TensorCore VMEM


def _pick_budget_and_limit():
    """Per-step input byte budget (f32-equivalent) and scoped-VMEM limit."""
    cap = _vmem_capacity_bytes()
    margin = 8 * 1024 * 1024
    budget = min(8 * 1024 * 1024,
                 max(1 * 1024 * 1024, (cap * 9 // 10 - margin) // 5))
    limit = min(cap * 9 // 10, 5 * budget + margin)
    return budget, limit


def _myloss_kernel(xt_ref, yt_ref, out_ref, acc_ref, *, n_rows, tile_sub,
                   tiles_per_split, need_mask):
    """Per-step partial sum of -log(selected) over a dense batch tile.

    xt_ref : (C,  TILE_SUB, 128)   scores, batch dense on (sublane, lane)
    yt_ref : (2C, TILE_SUB, 128)   target scores
    out_ref: (1, 8, 128)           per-split partial-sum slab (finalize only)
    acc_ref: (TILE_SUB, 128) f32   lane-resident running sum over inner axis
    """
    s = pl.program_id(0)
    i = pl.program_id(1)

    @pl.when(i == 0)
    def _init():
        acc_ref[...] = jnp.zeros_like(acc_ref)

    c = xt_ref.shape[0]
    k = yt_ref.shape[0]          # == 2 * c

    def load(ref, j):
        v = ref[j]
        # Cast only if inputs arrive narrow (e.g. bf16); compute stays f32
        # (v5e has no bf16 VPU path).
        return v if v.dtype == jnp.float32 else v.astype(jnp.float32)

    xs = [load(xt_ref, j) for j in range(c)]

    def cand(j):
        # Column j of hstack((1 - p, p)) with p = (x + 1) / 2, elementwise:
        #   j <  C -> 1 - p_j = (1 - x_j) / 2
        #   j >= C ->     p_j = (1 + x_{j-C}) / 2
        return (1.0 - xs[j]) * 0.5 if j < c else (1.0 + xs[j - c]) * 0.5

    # Unrolled running-max / first-argmax over the 2C class slices: strict `>`
    # keeps torch's first-max tie-breaking.  Pure VPU elementwise work.
    best = load(yt_ref, 0)
    sel = cand(0)
    for j in range(1, k):
        yj = load(yt_ref, j)
        gt = yj > best
        sel = jnp.where(gt, cand(j), sel)
        if j < k - 1:            # running max not needed after last class
            best = jnp.where(gt, yj, best)

    if need_mask:
        # Rows at/after n_rows belong to grid overshoot (stale / re-read
        # data); force their contribution to -log(1) = 0.
        row0 = (s * tiles_per_split + i) * tile_sub
        rows = jax.lax.broadcasted_iota(jnp.int32, (tile_sub, _LANES), 0) + row0
        sel = jnp.where(rows < n_rows, sel, 1.0)

    # NOTE: selected == 0 yields -inf/NaN exactly like the PyTorch reference;
    # no eps is added on purpose (parity).
    acc_ref[...] += -jnp.log(sel)

    @pl.when(i == pl.num_programs(1) - 1)
    def _finalize():
        col = jnp.sum(acc_ref[...], axis=0, keepdims=True)    # (1, 128) vreg adds
        tot = jnp.sum(col, axis=1, keepdims=True)             # (1, 1)   one XLU reduce
        out_ref[...] = jnp.broadcast_to(tot.reshape(1, 1, 1), out_ref.shape)


def my_loss(x, y, *, tile_sub=None, num_splits=None, tile_input_bytes=None):
    """Pallas TPU forward of MyLoss: x (N, C), y (N, 2C) -> scalar f32 loss."""
    if x.ndim != 2 or y.ndim != 2:
        raise ValueError("expected x (N, C) and y (N, 2C)")
    n, c = x.shape
    k = y.shape[1]
    if y.shape[0] != n or k != 2 * c:
        raise ValueError(f"shape mismatch: x {x.shape}, y {y.shape}")

    budget, vmem_limit = _pick_budget_and_limit()
    if tile_input_bytes is not None:
        budget = int(tile_input_bytes)
    if num_splits is None:
        num_splits = _num_tensorcores_per_device()

    # Minimal padding: round N to one (8 x 128) slab only.  Padded entries are
    # built to contribute exactly -log(1) = 0:
    #   x := -1 -> 1 - p = 1 ; y := 0 -> argmax stays at class 0 (< C).
    n_pad = _round_up(n, _SUBLANES * _LANES)
    pad = n_pad - n
    xp = jnp.pad(x, ((0, pad), (0, 0)), constant_values=-1.0) if pad else x
    yp = jnp.pad(y, ((0, pad), (0, 0)), constant_values=0.0) if pad else y
    n_rows = n_pad // _LANES                       # multiple of 8

    # Lane+sublane dense repack: batch fills whole (8, 128) vregs; classes sit
    # on the leading (untiled) axis.  For C == 1 the x repack is a free
    # reshape; y needs the one transpose copy (accepted as the only extra pass).
    xt = (xp if c == 1 else xp.T).reshape(c, n_rows, _LANES)
    yt = yp.T.reshape(k, n_rows, _LANES)

    # Tile rows per grid step from the per-step byte budget (f32-equivalent,
    # so bf16 inputs never inflate the f32 temporaries past the VMEM plan).
    if tile_sub is None:
        per_row = _LANES * 3 * c * 4
        tile_sub = max(_SUBLANES, budget // per_row)
    tile_sub = int(min(int(tile_sub), n_rows))
    tile_sub = max(_SUBLANES, (tile_sub // _SUBLANES) * _SUBLANES)

    tiles_valid = pl.cdiv(n_rows, tile_sub)
    num_splits = max(1, min(int(num_splits), tiles_valid))
    tiles_per_split = pl.cdiv(tiles_valid, num_splits)
    coverage = num_splits * tiles_per_split * tile_sub
    need_mask = coverage != n_rows                 # static: mask compiled only if needed
    last_block = tiles_valid - 1
    tps = tiles_per_split

    def in_map(s, i):
        b = s * tps + i
        if need_mask:
            # Overshoot steps re-read the last valid block (never an OOB DMA);
            # their rows are masked to a zero contribution in-kernel.
            b = jnp.minimum(b, last_block)
        return (0, b, 0)

    kernel = functools.partial(
        _myloss_kernel, n_rows=n_rows, tile_sub=tile_sub,
        tiles_per_split=tps, need_mask=need_mask)

    grid_spec = pltpu.PrefetchScalarGridSpec(
        num_scalar_prefetch=0,
        grid=(num_splits, tiles_per_split),
        in_specs=[
            pl.BlockSpec((c, tile_sub, _LANES), in_map),
            pl.BlockSpec((k, tile_sub, _LANES), in_map),
        ],
        # One unmasked (8, 128) partial-sum slab per parallel split, written
        # exactly once at the split's final inner step.
        out_specs=pl.BlockSpec((1, _SUBLANES, _LANES), lambda s, i: (s, 0, 0)),
        scratch_shapes=[pltpu.VMEM((tile_sub, _LANES), jnp.float32)],
    )

    partials = pl.pallas_call(
        kernel,
        out_shape=jax.ShapeDtypeStruct((num_splits, _SUBLANES, _LANES),
                                       jnp.float32),
        grid_spec=grid_spec,
        compiler_params=pltpu.CompilerParams(
            # Outer split axis shards across 2-TensorCore chips; inner axis is
            # the sequential reduction that owns the accumulator.
            dimension_semantics=("parallel", "arbitrary"),
            vmem_limit_bytes=int(vmem_limit),
        ),
    )(xt, yt)

    # Each split's slab is its scalar partial sum broadcast over (8, 128).
    return jnp.sum(partials[:, 0, 0]) / n


def my_loss_ref(x, y):
    """Pure-JAX reference mirroring the PyTorch forward."""
    p = (x + 1.0) / 2.0
    full = jnp.concatenate([1.0 - p, p], axis=1)
    idx = jnp.argmax(y, axis=1)
    sel = full[jnp.arange(x.shape[0]), idx]
    return jnp.mean(-jnp.log(sel))


if __name__ == "__main__":
    key = jax.random.PRNGKey(0)
    k1, k2, k3, k4 = jax.random.split(key, 4)

    # Case 1: the binary case the module implies (x: (N, 1), y: (N, 2) one-hot).
    n1, c1 = 8, 1
    x1 = jax.random.uniform(k1, (n1, c1), jnp.float32, minval=-0.95, maxval=0.95)
    y1 = jax.nn.one_hot(jax.random.randint(k2, (n1,), 0, 2 * c1), 2 * c1,
                        dtype=jnp.float32)
    out1 = jax.block_until_ready(my_loss(x1, y1))
    ref1 = my_loss_ref(x1, y1)
    assert jnp.allclose(out1, ref1, rtol=1e-5, atol=1e-5), (out1, ref1)

    # Case 2: multi-class scores with a ragged batch, forced tiny tile and two
    # splits to exercise the multi-step accumulator, the index clamp and the
    # tail-mask paths (grid = (2 splits, 2 inner steps), last block overshoots).
    n2, c2 = 2500, 3
    x2 = jax.random.uniform(k3, (n2, c2), jnp.float32, minval=-0.95, maxval=0.95)
    y2 = jax.random.uniform(k4, (n2, 2 * c2), jnp.float32)
    out2 = jax.block_until_ready(my_loss(x2, y2, tile_sub=8, num_splits=2))
    ref2 = my_loss_ref(x2, y2)
    assert jnp.allclose(out2, ref2, rtol=1e-5, atol=1e-5), (out2, ref2)

    # Case 3: same data through the default (auto-tiled) path.
    out3 = jax.block_until_ready(my_loss(x2, y2))
    assert jnp.allclose(out3, ref2, rtol=1e-5, atol=1e-5), (out3, ref2)

    print("KERNEL_OK")
</pallas_src>

<mosaic_0001>
module attributes {stable_mosaic.version = 11 : i64} {
  func.func @_myloss_kernel(%arg0: i32, %arg1: i32, %arg2: memref<1x8x128xf32, #tpu.memory_space<vmem>>, %arg3: memref<2x8x128xf32, #tpu.memory_space<vmem>>, %arg4: memref<1x8x128xf32, #tpu.memory_space<vmem>>, %arg5: memref<8x128xf32, #tpu.memory_space<vmem>>) attributes {dimension_semantics = [#tpu.dimension_semantics<parallel>, #tpu.dimension_semantics<arbitrary>], iteration_bounds = array<i64: 1, 1>, scalar_prefetch = 0 : i64, scratch_operands = 1 : i64, tpu.core_type = #tpu.core_type<tc>, window_params = [{transform_indices = @transform_0, window_bounds = array<i64: 1, 8, 128>}, {transform_indices = @transform_1, window_bounds = array<i64: 2, 8, 128>}, {transform_indices = @transform_2, window_bounds = array<i64: 1, 8, 128>}]} {
    %c0_i32 = arith.constant 0 : i32
    %0 = arith.cmpi eq, %arg1, %c0_i32 : i32
    %1 = arith.extui %0 : i1 to i32
    %c0_i32_0 = arith.constant 0 : i32
    %2 = arith.cmpi ne, %1, %c0_i32_0 : i32
    scf.if %2 {
      %cst_18 = arith.constant 0.000000e+00 : f32
      %28 = vector.broadcast %cst_18 : f32 to vector<8x128xf32>
      %c0_19 = arith.constant 0 : index
      %c0_20 = arith.constant 0 : index
      %29 = vector.load %arg5[%c0_19, %c0_20] : memref<8x128xf32, #tpu.memory_space<vmem>>, vector<8x128xf32>
      tpu.vector_store %arg5[%c0_19, %c0_20], %28 {strides = array<i32>} : memref<8x128xf32, #tpu.memory_space<vmem>>, vector<8x128xf32>,
    } else {
    }
    %c0 = arith.constant 0 : index
    %c0_1 = arith.constant 0 : index
    %c0_2 = arith.constant 0 : index
    %3 = vector.load %arg2[%c0, %c0_1, %c0_2] : memref<1x8x128xf32, #tpu.memory_space<vmem>>, vector<1x8x128xf32>
    %4 = vector.shape_cast %3 : vector<1x8x128xf32> to vector<8x128xf32>
    %c0_3 = arith.constant 0 : index
    %c0_4 = arith.constant 0 : index
    %c0_5 = arith.constant 0 : index
    %5 = vector.load %arg3[%c0_3, %c0_4, %c0_5] : memref<2x8x128xf32, #tpu.memory_space<vmem>>, vector<1x8x128xf32>
    %6 = vector.shape_cast %5 : vector<1x8x128xf32> to vector<8x128xf32>
    %cst = arith.constant 1.000000e+00 : f32
    %7 = vector.broadcast %cst : f32 to vector<8x128xf32>
    %8 = arith.subf %7, %4 : vector<8x128xf32>
    %cst_6 = arith.constant 5.000000e-01 : f32
    %9 = vector.broadcast %cst_6 : f32 to vector<8x128xf32>
    %10 = arith.mulf %8, %9 : vector<8x128xf32>
    %c1 = arith.constant 1 : index
    %c0_7 = arith.constant 0 : index
    %c0_8 = arith.constant 0 : index
    %11 = vector.load %arg3[%c1, %c0_7, %c0_8] : memref<2x8x128xf32, #tpu.memory_space<vmem>>, vector<1x8x128xf32>
    %12 = vector.shape_cast %11 : vector<1x8x128xf32> to vector<8x128xf32>
    %13 = arith.cmpf ogt, %12, %6 : vector<8x128xf32>
    %cst_9 = arith.constant 1.000000e+00 : f32
    %14 = vector.broadcast %cst_9 : f32 to vector<8x128xf32>
    %15 = arith.addf %14, %4 : vector<8x128xf32>
    %cst_10 = arith.constant 5.000000e-01 : f32
    %16 = vector.broadcast %cst_10 : f32 to vector<8x128xf32>
    %17 = arith.mulf %15, %16 : vector<8x128xf32>
    %18 = arith.select %13, %17, %10 : vector<8x128xi1>, vector<8x128xf32>
    %c0_11 = arith.constant 0 : index
    %c0_12 = arith.constant 0 : index
    %19 = vector.load %arg5[%c0_11, %c0_12] : memref<8x128xf32, #tpu.memory_space<vmem>>, vector<8x128xf32>
    %20 = math.log %18 : vector<8x128xf32>
    %cst_13 = arith.constant 0.000000e+00 : f32
    %21 = vector.broadcast %cst_13 : f32 to vector<8x128xf32>
    %22 = arith.subf %21, %20 : vector<8x128xf32>
    %23 = arith.addf %19, %22 : vector<8x128xf32>
    %c0_14 = arith.constant 0 : index
    %c0_15 = arith.constant 0 : index
    %24 = vector.load %arg5[%c0_14, %c0_15] : memref<8x128xf32, #tpu.memory_space<vmem>>, vector<8x128xf32>
    tpu.vector_store %arg5[%c0_14, %c0_15], %23 {strides = array<i32>} : memref<8x128xf32, #tpu.memory_space<vmem>>, vector<8x128xf32>,
    %c0_i32_16 = arith.constant 0 : i32
    %25 = arith.cmpi eq, %arg1, %c0_i32_16 : i32
    %26 = arith.extui %25 : i1 to i32
    %c0_i32_17 = arith.constant 0 : i32
    %27 = arith.cmpi ne, %26, %c0_i32_17 : i32
    scf.if %27 {
      %c0_18 = arith.constant 0 : index
      %c0_19 = arith.constant 0 : index
      %28 = vector.load %arg5[%c0_18, %c0_19] : memref<8x128xf32, #tpu.memory_space<vmem>>, vector<8x128xf32>
      %cst_20 = arith.constant dense<0.000000e+00> : vector<128xf32>
      %29 = vector.multi_reduction <add>, %28, %cst_20 [0] : vector<8x128xf32> to vector<128xf32>
      %30 = vector.shape_cast %29 : vector<128xf32> to vector<1x128xf32>
      %cst_21 = arith.constant dense<0.000000e+00> : vector<1xf32>
      %31 = vector.multi_reduction <add>, %30, %cst_21 [1] : vector<1x128xf32> to vector<1xf32>
      %32 = vector.shape_cast %31 : vector<1xf32> to vector<1x1xf32>
      %33 = vector.shape_cast %32 : vector<1x1xf32> to vector<1x1x1xf32>
      %34 = vector.shape_cast %33 : vector<1x1x1xf32> to vector<1x1x1xf32>
      %35 = vector.broadcast %34 : vector<1x1x1xf32> to vector<1x8x128xf32>
      %c0_22 = arith.constant 0 : index
      %c0_23 = arith.constant 0 : index
      %c0_24 = arith.constant 0 : index
      %36 = vector.load %arg4[%c0_22, %c0_23, %c0_24] : memref<1x8x128xf32, #tpu.memory_space<vmem>>, vector<1x8x128xf32>
      tpu.vector_store %arg4[%c0_22, %c0_23, %c0_24], %35 {strides = array<i32>} : memref<1x8x128xf32, #tpu.memory_space<vmem>>, vector<1x8x128xf32>,
    } else {
    }
    return
  }
  func.func @transform_0(%arg0: i32, %arg1: i32) -> (i32, i32, i32) {
    %c1_i32 = arith.constant 1 : i32
    %0 = arith.muli %arg0, %c1_i32 : i32
    %1 = arith.addi %0, %arg1 : i32
    %c0_i32 = arith.constant 0 : i32
    %c0_i32_0 = arith.constant 0 : i32
    %c0_i32_1 = arith.constant 0 : i32
    return %c0_i32, %1, %c0_i32_0 : i32, i32, i32
  }
  func.func @transform_1(%arg0: i32, %arg1: i32) -> (i32, i32, i32) {
    %c1_i32 = arith.constant 1 : i32
    %0 = arith.muli %arg0, %c1_i32 : i32
    %1 = arith.addi %0, %arg1 : i32
    %c0_i32 = arith.constant 0 : i32
    %c0_i32_0 = arith.constant 0 : i32
    %c0_i32_1 = arith.constant 0 : i32
    return %c0_i32, %1, %c0_i32_0 : i32, i32, i32
  }
  func.func @transform_2(%arg0: i32, %arg1: i32) -> (i32, i32, i32) {
    %c0_i32 = arith.constant 0 : i32
    %c0_i32_0 = arith.constant 0 : i32
    %c0_i32_1 = arith.constant 0 : i32
    return %arg0, %c0_i32, %c0_i32_0 : i32, i32, i32
  }
}

</mosaic_0001>

<bundles_post_ra>
// kernel: tpu_custom_call.1
= control target key start
LH: loop header
LB: loop body
LE: loop exit
PB: predicated region body
PF: predicated region fallthrough
CT: control target
= control target key end

     0   :  { %7 = vsyncpa [#allocation4], 0  ;;  %s238_s0 = inlined_call_operand.hbm [shape: f32[1,8,128], index: 0, kind: input, shape index: {}]   ;;  %s239_s1 = inlined_call_operand.hbm [shape: f32[2,8,128], index: 1, kind: input, shape index: {}]   ;;  %s240_s2 = inlined_call_operand.hbm [shape: f32[1,8,128], index: 2, kind: output, shape index: {}]  }
   0x1   :  { %8 = vsyncpa [#allocation7], 0 }
   0x2   :  { %9 = vsyncpa [#allocation5], 0  ;;  %s175_s9 = smov [#allocation3]   ;;  %s176_s11 = smov [#allocation6]  }
   0x3   :  { %s19_s10 = sshll.u32 %s175_s9, 4  ;;  %s31_s12 = sshll.u32 %s176_s11, 4  ;;  %s20_s10 = int_to_ptr.vmem [resolvable:$true] %s19_s10  ;;  %s195_s12 = int_to_ptr.vmem [resolvable:$true] %s31_s12 }
   0x4   :  { %s103_s15 = scalar_lea.hbm %s238_s0, 128 }
   0x5   :  { %p104_p0 = scmp.ne.s32.totalorder %s238_s0, %s103_s15  ;;  %p107_p1 = scmp.lt.u32.totalorder %s103_s15, %s238_s0 }
   0x7   :  { %p109_p2 = pnand %p107_p1, %p104_p0 }
   0x9   :  { %112 = shalt.err (!%p109_p2)
}
   0xa   :  { %s113_s20 = scalar_lea.vmem %s20_s10, 128  ;;  %p118_p4 = scmp.lt.s32.totalorder %s20_s10, %s20_s10 }
   0xb   :  { %p114_p3 = scmp.ne.s32.totalorder %s20_s10, %s113_s20  ;;  %p119_p5 = scmp.lt.s32.totalorder %s113_s20, %s113_s20 }
   0xd   :  { %p120_p6 = por %p119_p5, %p118_p4 }
   0xf   :  { %p121_p7 = pnand %p120_p6, %p114_p3 }
  0x11   :  { %124 = shalt.err (!%p121_p7)
}
  0x12   :  { %22 = dma.hbm_to_vmem [thread:$0]  %s238_s0, 128, %s20_s10, [#allocation4]  }
  0x13   :  { %s125_s25 = scalar_lea.hbm %s239_s1, 256 }
  0x14   :  { %p126_p8 = scmp.ne.s32.totalorder %s239_s1, %s125_s25  ;;  %p129_p9 = scmp.lt.u32.totalorder %s125_s25, %s239_s1 }
  0x16   :  { %p131_p10 = pnand %p129_p9, %p126_p8 }
  0x18   :  { %134 = shalt.err (!%p131_p10)
}
  0x19   :  { %s135_s30 = scalar_lea.vmem %s195_s12, 256  ;;  %p140_p12 = scmp.lt.s32.totalorder %s195_s12, %s195_s12 }
  0x1a   :  { %p136_p11 = scmp.ne.s32.totalorder %s195_s12, %s135_s30  ;;  %p141_p13 = scmp.lt.s32.totalorder %s135_s30, %s135_s30 }
  0x1c   :  { %p142_p0 = por %p141_p13, %p140_p12 }
  0x1e   :  { %p143_p1 = pnand %p142_p0, %p136_p11 }
  0x20   :  { %146 = shalt.err (!%p143_p1)
}
  0x21   :  { %s177_s0 = smov 128   ;;  %s178_s3 = smov 8  }
  0x22   :  { %37 = dma.hbm_to_vmem [thread:$0]  %s239_s1, 256, %s195_s12, [#allocation7], %s177_s0, %s177_s0, %s178_s3  }
  0x23   :  { %169 = dma.done.wait [#allocation4], 128  }
  0x24   :  { %170 = vsyncadd [#allocation4], 4294967168 }
  0x25   :  { %171 = dma.done.wait [#allocation7], 256  }
  0x26   :  { %172 = vsyncadd [#allocation7], 4294967040  ;;  %v51_v0 = vld [vmem:[#allocation3] sm:$0xff]  ;;  %v52_v1 = vld [vmem:[#allocation6] sm:$0xff]  ;;  %s179_s1 = smov [#allocation8]  }
  0x27   :  { %v56_v2 = vld [vmem:[#allocation6 + $0x8] sm:$0xff]  ;;  %v53_v3 = vsub.f32 1.0, %v51_v0  ;;  %v58_v4 = vadd.f32 1.0, %v51_v0  ;;  %s86_s6 = sshll.u32 %s179_s1, 4  ;;  %s87_s6 = int_to_ptr.vmem [resolvable:$true] %s86_s6 }
  0x28   :  { %vm57_vm0 = vcmp.gt.f32.partialorder %v56_v2, %v52_v1  ;;  %s147_s7 = scalar_lea.vmem %s87_s6, 128  ;;  %p152_p3 = scmp.lt.s32.totalorder %s87_s6, %s87_s6 }
  0x29   :  { %v54_v5 = vmul.f32 0.5, %v53_v3  ;;  %v59_v6 = vmul.f32 0.5, %v58_v4  ;;  %p148_p2 = scmp.ne.s32.totalorder %s87_s6, %s147_s7  ;;  %p153_p4 = scmp.lt.s32.totalorder %s147_s7, %s147_s7 }
  0x2b   :  { %v60_v7 = vsel %vm57_vm0, %v59_v6, %v54_v5  ;;  %p154_p5 = por %p153_p4, %p152_p3 }
  0x2c   :  { %101 = vlog2.f32 %v60_v7 }
  0x2d   :  { %p155_p6 = pnand %p154_p5, %p148_p2 }
  0x36   :  { %v102_v8 = vpop.eup %101 }
  0x37   :  { %v63_v9 = vmul.f32 0.6931472, %v102_v8 }
  0x39   :  { %v64_v10 = vsub.f32 0.0, %v63_v9 }
  0x3b   :  { %v71_v11 = vrot.slane %v64_v10, 4 }
  0x3d   :  { %v72_v12 = vadd.f32 %v71_v11, %v64_v10 }
  0x3f   :  { %v73_v13 = vrot.slane %v72_v12, 2 }
  0x41   :  { %v74_v14 = vadd.f32 %v73_v13, %v72_v12 }
  0x43   :  { %v75_v15 = vrot.slane %v74_v14, 1 }
  0x45   :  { %v76_v16 = vadd.f32 %v75_v15, %v74_v14 }
  0x47   :  { %77 = vadd.xlane.f32.xlu0 %v76_v16 }
  0xd4   :  { %v78_v17 = vpop.xlane.xlu0 %77 }
  0xd5   :  { %79 = vst [vmem:[#allocation8] sm:$0xff] %v78_v17 }
  0xd6   :  { %158 = shalt.err (!%p155_p6)
}
  0xd7   :  { %s159_s10 = scalar_lea.hbm %s240_s2, 128 }
  0xd8   :  { %p160_p7 = scmp.ne.s32.totalorder %s240_s2, %s159_s10  ;;  %p163_p8 = scmp.lt.u32.totalorder %s159_s10, %s240_s2 }
  0xda   :  { %p165_p9 = pnand %p163_p8, %p160_p7 }
  0xdc   :  { %168 = shalt.err (!%p165_p9)
}
  0xdd   :  { %89 = dma.vmem_to_hbm [thread:$0]  %s87_s6, 128, %s240_s2, [#allocation5]  }
  0xde   :  { %173 = dma.done.wait [#allocation5], 128  }
  0xdf   :  { %174 = vsyncadd [#allocation5], 4294967168 }
  0xe0   :  { %93 = vsyncpa [#allocation4], 1 }
  0xe1   :  { %94 = vsyncpa [#allocation7], 1 }
  0xe2   :  { %95 = vsyncpa [#allocation5], 1 }

</bundles_post_ra>
